<compile_context>
chip_gen: v7x
topology: tpu7x:2x2x1
jax: 0.10.0
libtpu: 0.0.40
codegen_flags: <defaults>
</compile_context>

<pallas_src>
import jax
import jax.numpy as jnp
from jax.experimental import pallas as pl
from jax.experimental.pallas import tpu as pltpu

HIDDEN = 128


def _round_up(n, m):
    return ((n + m - 1) // m) * m


def _command_mlp_kernel(x_ref, w1_ref, b1_ref, w2_ref, b2_ref, o_ref):
    # x arrives as f32 straight from HBM (no wrapper cast / extra HBM pass); the
    # bf16 cast is a cheap VPU op hidden under the DMA stream.
    x = x_ref[...].astype(jnp.bfloat16)
    # Weights are VMEM-resident across grid steps (constant index_map); casting the
    # ~20K elements here per step is negligible and avoids per-call wrapper cast ops.
    w1 = w1_ref[...].astype(jnp.bfloat16)
    w2 = w2_ref[...].astype(jnp.bfloat16)

    # fc1: bf16 operands on the MXU, f32 accumulation; bias + ReLU epilogue in f32.
    h = jnp.dot(x, w1, preferred_element_type=jnp.float32)
    h = jnp.maximum(h + b1_ref[...], 0.0)          # b1 is (1, 128) -> broadcasts over rows
    # TODO(synk): training-mode dropout (pltpu.prng_seed + pltpu.prng_random_bits mask
    # with 1/(1-p) rescale) not emitted; this kernel implements eval-mode semantics.

    # fc2: recast activation to bf16 for the second MXU pass, accumulate in f32.
    y = jnp.dot(h.astype(jnp.bfloat16), w2, preferred_element_type=jnp.float32)
    y = jnp.maximum(y + b2_ref[...], 0.0)
    o_ref[...] = y.astype(o_ref.dtype)


def command_module_forward(x, w1, b1, w2, b2, *, block_b=2048, out_dtype=jnp.float32):
    """Fused CommandModule forward (eval mode).

    x : [B, C] float32
    w1: [C, 128], w2: [128, 128]   (transposed vs. PyTorch nn.Linear.weight)
    b1, b2: [1, 128]
    out_dtype: jnp.float32 (module-faithful, default) or jnp.bfloat16 (halves the
               dominant output store stream if the consumer allows it).
    """
    B, C = x.shape
    H = w1.shape[1]
    assert w1.shape == (C, H) and w2.shape == (H, H)
    assert b1.shape == (1, H) and b2.shape == (1, H)

    # Batch tile: multiple of 8 (sublanes), large enough to amortize ~0.35 us/step.
    tb = max(8, min(block_b, _round_up(B, 8)))
    # v7x: ensure >=2 "parallel" grid steps for large batches so the 2-TC megacore
    # split has work for both cores (no effect on small B or on single-TC v5e/v6e).
    if B >= 1024 and pl.cdiv(B, tb) < 2:
        tb = _round_up(pl.cdiv(B, 2), 8)

    # Ragged last block: Pallas masks the out-of-bounds stores, so no jnp.pad of x
    # and no out[:B] slice (both were full extra HBM passes).
    grid = (pl.cdiv(B, tb),)

    # Conservative working-set estimate: double-buffered x/out tiles, f32 h temp,
    # single-buffered (resident) weights/biases.
    out_itemsize = jnp.dtype(out_dtype).itemsize
    vmem_est = (2 * tb * C * 4            # x tile, f32, double-buffered
                + 2 * tb * H * out_itemsize   # out tile, double-buffered
                + tb * H * 4              # f32 hidden intermediate
                + (C * H + H * H + 2 * H) * 4)
    cp_kwargs = dict(dimension_semantics=("parallel",))
    if vmem_est > (12 << 20):
        # v5e default scoped VMEM is 16 MiB; raise for big tiles but stay well under
        # v7x's 64 MiB physical per-TC budget.
        cp_kwargs["vmem_limit_bytes"] = min(int(vmem_est * 3 // 2), 48 << 20)

    return pl.pallas_call(
        _command_mlp_kernel,
        out_shape=jax.ShapeDtypeStruct((B, H), out_dtype),
        grid_spec=pl.GridSpec(
            grid=grid,
            in_specs=[
                pl.BlockSpec((tb, C), lambda i: (i, 0)),   # x : streamed over batch tiles
                pl.BlockSpec((C, H), lambda i: (0, 0)),    # w1: VMEM-resident across steps
                pl.BlockSpec((1, H), lambda i: (0, 0)),    # b1: VMEM-resident
                pl.BlockSpec((H, H), lambda i: (0, 0)),    # w2: VMEM-resident
                pl.BlockSpec((1, H), lambda i: (0, 0)),    # b2: VMEM-resident
            ],
            out_specs=pl.BlockSpec((tb, H), lambda i: (i, 0)),
        ),
        compiler_params=pltpu.CompilerParams(**cp_kwargs),
    )(x, w1, b1, w2, b2)


def reference_forward_bf16(x, w1, b1, w2, b2):
    """Mirrors the kernel's bf16-operand / f32-accumulate arithmetic."""
    xb = x.astype(jnp.bfloat16)
    w1b = w1.astype(jnp.bfloat16)
    w2b = w2.astype(jnp.bfloat16)
    h = jnp.dot(xb, w1b, preferred_element_type=jnp.float32)
    h = jnp.maximum(h + b1, 0.0)
    y = jnp.dot(h.astype(jnp.bfloat16), w2b, preferred_element_type=jnp.float32)
    return jnp.maximum(y + b2, 0.0)


def reference_forward_f32(x, w1, b1, w2, b2):
    h = jnp.maximum(x @ w1 + b1, 0.0)
    return jnp.maximum(h @ w2 + b2, 0.0)


if __name__ == "__main__":
    num_commands = 32
    hidden = HIDDEN

    key = jax.random.PRNGKey(0)
    kx, kw1, kb1, kw2, kb2, kx2 = jax.random.split(key, 6)

    # Deterministic synthetic parameters (PyTorch nn.Linear-like uniform init).
    bound1 = 1.0 / (num_commands ** 0.5)
    bound2 = 1.0 / (hidden ** 0.5)
    w1 = jax.random.uniform(kw1, (num_commands, hidden), jnp.float32, -bound1, bound1)
    b1 = jax.random.uniform(kb1, (1, hidden), jnp.float32, -bound1, bound1)
    w2 = jax.random.uniform(kw2, (hidden, hidden), jnp.float32, -bound2, bound2)
    b2 = jax.random.uniform(kb2, (1, hidden), jnp.float32, -bound2, bound2)

    # --- Test 1: small batch, single tile, f32 output (module-faithful) ---
    batch = 8
    x = jax.random.normal(kx, (batch, num_commands), dtype=jnp.float32)
    out = jax.block_until_ready(command_module_forward(x, w1, b1, w2, b2))
    assert out.shape == (batch, hidden) and out.dtype == jnp.float32
    ref = reference_forward_bf16(x, w1, b1, w2, b2)
    assert jnp.allclose(out, ref, atol=2e-3, rtol=2e-3)
    # Loose sanity check against the full-f32 semantics of the PyTorch module.
    ref32 = reference_forward_f32(x, w1, b1, w2, b2)
    assert jnp.allclose(out, ref32, atol=1e-1, rtol=5e-2)

    # --- Test 2: non-multiple-of-tile batch, small tile -> exercises the ragged last
    #             block (masked OOB stores, no pad/slice), multi-step grid, and
    #             VMEM-resident weights across steps ---
    batch2 = 20
    x2 = jax.random.normal(kx2, (batch2, num_commands), dtype=jnp.float32)
    out2 = jax.block_until_ready(
        command_module_forward(x2, w1, b1, w2, b2, block_b=8))
    assert out2.shape == (batch2, hidden)
    ref2 = reference_forward_bf16(x2, w1, b1, w2, b2)
    assert jnp.allclose(out2, ref2, atol=2e-3, rtol=2e-3)

    # --- Test 3: bf16 output path (halved store stream) ---
    out3 = jax.block_until_ready(
        command_module_forward(x2, w1, b1, w2, b2, block_b=8,
                               out_dtype=jnp.bfloat16))
    assert out3.shape == (batch2, hidden) and out3.dtype == jnp.bfloat16
    assert jnp.allclose(out3.astype(jnp.float32), ref2, atol=3e-2, rtol=3e-2)

    print("KERNEL_OK")
</pallas_src>

<mosaic_0001>
module attributes {stable_mosaic.version = 11 : i64} {
  func.func @_command_mlp_kernel(%arg0: i32, %arg1: memref<8x32xf32, #tpu.memory_space<vmem>>, %arg2: memref<32x128xf32, #tpu.memory_space<vmem>>, %arg3: memref<1x128xf32, #tpu.memory_space<vmem>>, %arg4: memref<128x128xf32, #tpu.memory_space<vmem>>, %arg5: memref<1x128xf32, #tpu.memory_space<vmem>>, %arg6: memref<8x128xf32, #tpu.memory_space<vmem>>) attributes {dimension_semantics = [#tpu.dimension_semantics<parallel>], iteration_bounds = array<i64: 1>, scalar_prefetch = 0 : i64, scratch_operands = 0 : i64, tpu.core_type = #tpu.core_type<tc>, window_params = [{transform_indices = @transform_0, window_bounds = array<i64: 8, 32>}, {pipeline_mode = #tpu.pipeline_mode<synchronous>, transform_indices = @transform_1, window_bounds = array<i64: 32, 128>}, {pipeline_mode = #tpu.pipeline_mode<synchronous>, transform_indices = @transform_2, window_bounds = array<i64: 1, 128>}, {pipeline_mode = #tpu.pipeline_mode<synchronous>, transform_indices = @transform_3, window_bounds = array<i64: 128, 128>}, {pipeline_mode = #tpu.pipeline_mode<synchronous>, transform_indices = @transform_4, window_bounds = array<i64: 1, 128>}, {transform_indices = @transform_5, window_bounds = array<i64: 8, 128>}]} {
    %c0 = arith.constant 0 : index
    %c0_0 = arith.constant 0 : index
    %0 = vector.load %arg1[%c0, %c0_0] : memref<8x32xf32, #tpu.memory_space<vmem>>, vector<8x32xf32>
    %1 = arith.truncf %0 : vector<8x32xf32> to vector<8x32xbf16>
    %c0_1 = arith.constant 0 : index
    %c0_2 = arith.constant 0 : index
    %2 = vector.load %arg2[%c0_1, %c0_2] : memref<32x128xf32, #tpu.memory_space<vmem>>, vector<32x128xf32>
    %3 = arith.truncf %2 : vector<32x128xf32> to vector<32x128xbf16>
    %c0_3 = arith.constant 0 : index
    %c0_4 = arith.constant 0 : index
    %4 = vector.load %arg4[%c0_3, %c0_4] : memref<128x128xf32, #tpu.memory_space<vmem>>, vector<128x128xf32>
    %5 = arith.truncf %4 : vector<128x128xf32> to vector<128x128xbf16>
    %cst = arith.constant dense<0.000000e+00> : vector<8x128xf32>
    %6 = tpu.matmul %1, %3, %cst {dimension_numbers = #tpu.dot_dimension_numbers<[1], [0], [0], [1], [0, 0, 1, 1], [], []>} : vector<8x32xbf16>, vector<32x128xbf16>, vector<8x128xf32> -> vector<8x128xf32>
    %c0_5 = arith.constant 0 : index
    %c0_6 = arith.constant 0 : index
    %7 = vector.load %arg3[%c0_5, %c0_6] : memref<1x128xf32, #tpu.memory_space<vmem>>, vector<1x128xf32>
    %8 = vector.broadcast %7 : vector<1x128xf32> to vector<8x128xf32>
    %9 = arith.addf %6, %8 : vector<8x128xf32>
    %cst_7 = arith.constant 0.000000e+00 : f32
    %10 = vector.broadcast %cst_7 : f32 to vector<8x128xf32>
    %11 = arith.maximumf %9, %10 : vector<8x128xf32>
    %12 = arith.truncf %11 : vector<8x128xf32> to vector<8x128xbf16>
    %cst_8 = arith.constant dense<0.000000e+00> : vector<8x128xf32>
    %13 = tpu.matmul %12, %5, %cst_8 {dimension_numbers = #tpu.dot_dimension_numbers<[1], [0], [0], [1], [0, 0, 1, 1], [], []>} : vector<8x128xbf16>, vector<128x128xbf16>, vector<8x128xf32> -> vector<8x128xf32>
    %c0_9 = arith.constant 0 : index
    %c0_10 = arith.constant 0 : index
    %14 = vector.load %arg5[%c0_9, %c0_10] : memref<1x128xf32, #tpu.memory_space<vmem>>, vector<1x128xf32>
    %15 = vector.broadcast %14 : vector<1x128xf32> to vector<8x128xf32>
    %16 = arith.addf %13, %15 : vector<8x128xf32>
    %cst_11 = arith.constant 0.000000e+00 : f32
    %17 = vector.broadcast %cst_11 : f32 to vector<8x128xf32>
    %18 = arith.maximumf %16, %17 : vector<8x128xf32>
    %c0_12 = arith.constant 0 : index
    %c0_13 = arith.constant 0 : index
    %19 = vector.load %arg6[%c0_12, %c0_13] : memref<8x128xf32, #tpu.memory_space<vmem>>, vector<8x128xf32>
    tpu.vector_store %arg6[%c0_12, %c0_13], %18 {strides = array<i32>} : memref<8x128xf32, #tpu.memory_space<vmem>>, vector<8x128xf32>,
    return
  }
  func.func @transform_0(%arg0: i32) -> (i32, i32) {
    %c0_i32 = arith.constant 0 : i32
    %c0_i32_0 = arith.constant 0 : i32
    return %arg0, %c0_i32 : i32, i32
  }
  func.func @transform_1(%arg0: i32) -> (i32, i32) {
    %c0_i32 = arith.constant 0 : i32
    %c0_i32_0 = arith.constant 0 : i32
    %c0_i32_1 = arith.constant 0 : i32
    return %c0_i32, %c0_i32_0 : i32, i32
  }
  func.func @transform_2(%arg0: i32) -> (i32, i32) {
    %c0_i32 = arith.constant 0 : i32
    %c0_i32_0 = arith.constant 0 : i32
    %c0_i32_1 = arith.constant 0 : i32
    return %c0_i32, %c0_i32_0 : i32, i32
  }
  func.func @transform_3(%arg0: i32) -> (i32, i32) {
    %c0_i32 = arith.constant 0 : i32
    %c0_i32_0 = arith.constant 0 : i32
    %c0_i32_1 = arith.constant 0 : i32
    return %c0_i32, %c0_i32_0 : i32, i32
  }
  func.func @transform_4(%arg0: i32) -> (i32, i32) {
    %c0_i32 = arith.constant 0 : i32
    %c0_i32_0 = arith.constant 0 : i32
    %c0_i32_1 = arith.constant 0 : i32
    return %c0_i32, %c0_i32_0 : i32, i32
  }
  func.func @transform_5(%arg0: i32) -> (i32, i32) {
    %c0_i32 = arith.constant 0 : i32
    %c0_i32_0 = arith.constant 0 : i32
    return %arg0, %c0_i32 : i32, i32
  }
}

</mosaic_0001>

<bundles_post_ra>
// kernel: tpu_custom_call.1
= control target key start
LH: loop header
LB: loop body
LE: loop exit
PB: predicated region body
PF: predicated region fallthrough
CT: control target
= control target key end

     0   :  { %10 = vsyncpa [#allocation3], 0  ;;  %s454_s0 = inlined_call_operand.hbm [shape: f32[8,32], index: 0, kind: input, shape index: {}]   ;;  %s455_s1 = inlined_call_operand.hbm [shape: f32[32,128], index: 1, kind: input, shape index: {}]   ;;  %s456_s2 = inlined_call_operand.vmem [shape: f32[1,128], index: 2, kind: input, shape index: {}]   ;;  %s457_s3 = inlined_call_operand.hbm [shape: f32[128,128], index: 3, kind: input, shape index: {}]   ;;  %s458_s4 = inlined_call_operand.vmem [shape: f32[1,128], index: 4, kind: input, shape index: {}]   ;;  %s459_s5 = inlined_call_operand.hbm [shape: f32[8,128], index: 5, kind: output, shape index: {}]  }
   0x1   :  { %11 = vsyncpa [#allocation6], 0 }
   0x2   :  { %12 = vsyncpa [#allocation4], 0  ;;  %s356_s18 = smov [#allocation5]   ;;  %s262_s22 = scalar_lea.hbm %s455_s1, 512 }
   0x3   :  { %s28_s19 = sshll.u32 %s356_s18, 4  ;;  %p263_p0 = scmp.ne.s32.totalorder %s455_s1, %s262_s22  ;;  %s29_s19 = int_to_ptr.vmem [resolvable:$true] %s28_s19 }
   0x4   :  { %p266_p1 = scmp.lt.u32.totalorder %s262_s22, %s455_s1 }
   0x6   :  { %p268_p2 = pnand %p266_p1, %p263_p0 }
   0x8   :  { %271 = shalt.err (!%p268_p2)
}
   0x9   :  { %s272_s27 = scalar_lea.vmem %s29_s19, 512  ;;  %p277_p4 = scmp.lt.s32.totalorder %s29_s19, %s29_s19 }
   0xa   :  { %p273_p3 = scmp.ne.s32.totalorder %s29_s19, %s272_s27  ;;  %p278_p5 = scmp.lt.s32.totalorder %s272_s27, %s272_s27 }
   0xc   :  { %p279_p6 = por %p278_p5, %p277_p4 }
   0xe   :  { %p280_p7 = pnand %p279_p6, %p273_p3 }
  0x10   :  { %283 = shalt.err (!%p280_p7)
}
  0x11   :  { %s357_s28 = smov 128   ;;  %s358_s29 = smov 8  }
  0x12   :  { %34 = dma.hbm_to_vmem [thread:$0]  %s455_s1, 512, %s29_s19, [#allocation6], %s357_s28, %s357_s28, %s358_s29  }
  0x13   :  { %s359_s7 = smov [#allocation2]   ;;  %s360_s9 = smov [#allocation7]  }
  0x14   :  { %s19_s8 = sshll.u32 %s359_s7, 4  ;;  %s42_s10 = sshll.u32 %s360_s9, 4  ;;  %s20_s8 = int_to_ptr.vmem [resolvable:$true] %s19_s8  ;;  %s43_s10 = int_to_ptr.vmem [resolvable:$true] %s42_s10 }
  0x15   :  { %s284_s13 = scalar_lea.hbm %s454_s0, 128 }
  0x16   :  { %p285_p8 = scmp.ne.s32.totalorder %s454_s0, %s284_s13  ;;  %p288_p9 = scmp.lt.u32.totalorder %s284_s13, %s454_s0 }
  0x18   :  { %p290_p10 = pnand %p288_p9, %p285_p8 }
  0x1a   :  { %293 = shalt.err (!%p290_p10)
}
  0x1b   :  { %s294_s1 = scalar_lea.vmem %s20_s8, 128  ;;  %p299_p12 = scmp.lt.s32.totalorder %s20_s8, %s20_s8 }
  0x1c   :  { %p295_p11 = scmp.ne.s32.totalorder %s20_s8, %s294_s1  ;;  %p300_p13 = scmp.lt.s32.totalorder %s294_s1, %s294_s1 }
  0x1e   :  { %p301_p0 = por %p300_p13, %p299_p12 }
  0x20   :  { %p302_p1 = pnand %p301_p0, %p295_p11 }
  0x22   :  { %305 = shalt.err (!%p302_p1)
}
  0x23   :  { %22 = dma.hbm_to_vmem [thread:$0]  %s454_s0, 128, %s20_s8, [#allocation3]  }
  0x24   :  { %s306_s22 = scalar_lea.hbm %s457_s3, 2048 }
  0x25   :  { %p307_p2 = scmp.ne.s32.totalorder %s457_s3, %s306_s22  ;;  %p310_p3 = scmp.lt.u32.totalorder %s306_s22, %s457_s3 }
  0x27   :  { %p312_p4 = pnand %p310_p3, %p307_p2 }
  0x29   :  { %315 = shalt.err (!%p312_p4)
}
  0x2a   :  { %s316_s27 = scalar_lea.vmem %s43_s10, 2048  ;;  %p321_p6 = scmp.lt.s32.totalorder %s43_s10, %s43_s10 }
  0x2b   :  { %p317_p5 = scmp.ne.s32.totalorder %s43_s10, %s316_s27  ;;  %p322_p7 = scmp.lt.s32.totalorder %s316_s27, %s316_s27 }
  0x2d   :  { %p323_p8 = por %p322_p7, %p321_p6 }
  0x2f   :  { %p324_p9 = pnand %p323_p8, %p317_p5 }
  0x31   :  { %327 = shalt.err (!%p324_p9)
}
  0x32   :  { %48 = dma.hbm_to_vmem [thread:$0]  %s457_s3, 2048, %s43_s10, [#allocation6], %s357_s28, %s357_s28, %s358_s29  }
  0x33   :  { %350 = dma.done.wait [#allocation3], 128  }
  0x34   :  { %351 = vsyncadd [#allocation3], 4294967168 }
  0x35   :  { %352 = dma.done.wait [#allocation6], 2560  }
  0x36   :  { %353 = vsyncadd [#allocation6], 4294964736  ;;  %v361_v0 = vmov 0.0   ;;  %vm362_vm0 = vmmov 0   ;;  %v63_v1 = vld [vmem:[#allocation5] sm:$0xff]  ;;  %v64_v2 = vld [vmem:[#allocation5 + $0x8] sm:$0xff] }
  0x37   :  { %226 = vmatprep.subr.bf16.mxu0 %v361_v0  ;;  %230 = vmatprep.mubr.msk.bf16.mxu0 %vm362_vm0, %v361_v0  ;;  %v65_v3 = vld [vmem:[#allocation5 + $0x10] sm:$0xff]  ;;  %v67_v4 = vpack.c.bf16 %v64_v2, %v63_v1  ;;  %v66_v5 = vld [vmem:[#allocation5 + $0x18] sm:$0xff]  ;;  %v69_v6 = vld [vmem:[#allocation7] sm:$0xff]  ;;  %vm100_vm1 = vcmask 261120   ;;  %s363_s7 = smov [#allocation8]  }
  0x38   :  { %234 = vmatprep.subr.bf16.mxu1 %v361_v0  ;;  %250 = vmatprep.mubr.msk.bf16.mxu1 %vm362_vm0, %v361_v0  ;;  %v70_v7 = vld [vmem:[#allocation7 + $0x8] sm:$0xff]  ;;  %v71_v8 = vld [vmem:[#allocation7 + $0x10] sm:$0xff]  ;;  %v72_v9 = vld [vmem:[#allocation7 + $0x18] sm:$0xff]  ;;  %v68_v10 = vpack.c.bf16 %v66_v5, %v65_v3  ;;  %s201_s8 = sshll.u32 %s363_s7, 4  ;;  %s202_s8 = int_to_ptr.vmem [resolvable:$true] %s201_s8 }
  0x39   :  { %227 = vmatpush3.bf16.msra.mxu0 %v67_v4  ;;  %v61_v11 = vld [vmem:[#allocation2] sm:$0xff]  ;;  %v85_v12 = vpack.c.bf16 %v70_v7, %v69_v6  ;;  %v86_v13 = vpack.c.bf16 %v72_v9, %v71_v8  ;;  %v73_v15 = vld [vmem:[#allocation7 + $0x20] sm:$0xff]  ;;  %v74_v16 = vld [vmem:[#allocation7 + $0x28] sm:$0xff]  ;;  %p333_p11 = scmp.lt.s32.totalorder %s202_s8, %s202_s8 }
  0x3a   :  { %228 = vmatprep.subr.bf16.mxu0 %v361_v0  ;;  %v62_v14 = vpack.c.bf16 %v61_v11, %v61_v11  ;;  %v87_v17 = vpack.c.bf16 %v74_v16, %v73_v15  ;;  %v75_v18 = vld [vmem:[#allocation7 + $0x30] sm:$0xff]  ;;  %v76_v19 = vld [vmem:[#allocation7 + $0x38] sm:$0xff]  ;;  %v77_v21 = vld [vmem:[#allocation7 + $0x40] sm:$0xff] }
  0x3b   :  { %235 = vmatpush3.bf16.msra.mxu1 %v85_v12  ;;  %v88_v20 = vpack.c.bf16 %v76_v19, %v75_v18  ;;  %v78_v22 = vld [vmem:[#allocation7 + $0x48] sm:$0xff]  ;;  %v79_v24 = vld [vmem:[#allocation7 + $0x50] sm:$0xff]  ;;  %v80_v25 = vld [vmem:[#allocation7 + $0x58] sm:$0xff] }
  0x3c   :  { %236 = vmatprep.subr.bf16.mxu1 %v361_v0  ;;  %v89_v23 = vpack.c.bf16 %v78_v22, %v77_v21  ;;  %v90_v26 = vpack.c.bf16 %v80_v25, %v79_v24  ;;  %v81_v27 = vld [vmem:[#allocation7 + $0x60] sm:$0xff]  ;;  %v82_v28 = vld [vmem:[#allocation7 + $0x68] sm:$0xff]  ;;  %v83_v30 = vld [vmem:[#allocation7 + $0x70] sm:$0xff] }
  0x3d   :  { %229 = vmatpush3.bf16.msra.mxu0 %v68_v10  ;;  %v91_v29 = vpack.c.bf16 %v82_v28, %v81_v27  ;;  %v84_v31 = vld [vmem:[#allocation7 + $0x78] sm:$0xff] }
  0x3e   :  { %v92_v32 = vpack.c.bf16 %v84_v31, %v83_v30  ;;  %v211_v33 = vld [vmem:[%s456_s2] ss:$0 sm:$0xff]  ;;  %s328_s2 = scalar_lea.vmem %s202_s8, 128 }
  0x3f   :  { %237 = vmatpush3.bf16.msra.mxu1 %v86_v13  ;;  %v213_v41 = vld [vmem:[%s458_s4] ss:$0 sm:$0xff]  ;;  %p329_p10 = scmp.ne.s32.totalorder %s202_s8, %s328_s2  ;;  %p334_p12 = scmp.lt.s32.totalorder %s328_s2, %s328_s2 }
  0x40   :  { %231 = vmatmul.mubr.msk.bf16.vlgmr.msra.gmra.mrb[0].mxu0 %vm100_vm1, %v62_v14  ;;  %238 = vmatprep.subr.bf16.mxu1 %v361_v0 }
  0x41   :  { %p335_p13 = por %p334_p12, %p333_p11 }
  0x43   :  { %239 = vmatpush3.bf16.msra.mxu1 %v87_v17  ;;  %p336_p0 = pnand %p335_p13, %p329_p10 }
  0x44   :  { %240 = vmatprep.subr.bf16.mxu1 %v361_v0 }
  0x47   :  { %241 = vmatpush3.bf16.msra.mxu1 %v88_v20 }
  0x48   :  { %242 = vmatprep.subr.bf16.mxu1 %v361_v0 }
  0x4b   :  { %243 = vmatpush3.bf16.msra.mxu1 %v89_v23 }
  0x4c   :  { %244 = vmatprep.subr.bf16.mxu1 %v361_v0 }
  0x4f   :  { %245 = vmatpush3.bf16.msra.mxu1 %v90_v26 }
  0x50   :  { %246 = vmatprep.subr.bf16.mxu1 %v361_v0 }
  0x53   :  { %247 = vmatpush3.bf16.msra.mxu1 %v91_v29 }
  0x54   :  { %248 = vmatprep.subr.bf16.mxu1 %v361_v0 }
  0x57   :  { %249 = vmatpush3.bf16.msra.mxu1 %v92_v32 }
 0x113   :  { %v138_v34 = vpop.f32.mrb[0].mxu0 }
 0x114   :  { %v139_v35 = vadd.f32 %v211_v33, %v138_v34  ;;  %v232_v36 = vpop.f32.mrb[1].mxu0 }
 0x115   :  { %v141_v37 = vpop.f32.mrb[2].mxu0 }
 0x116   :  { %v144_v38 = vmax.f32 %v139_v35, 0.0  ;;  %v233_v39 = vpop.f32.mrb[3].mxu0 }
 0x118   :  { %v145_v40 = vpack.c.bf16 %v144_v38, %v144_v38 }
 0x11a   :  { %251 = vmatmul.mubr.bf16.vlgmr.msra.gmra.mrb[0].mxu1 %v145_v40 }
 0x1ed   :  { %v187_v42 = vpop.f32.mrb[0].mxu1 }
 0x1ee   :  { %v188_v43 = vadd.f32 %v213_v41, %v187_v42  ;;  %v252_v44 = vpop.f32.mrb[1].mxu1 }
 0x1ef   :  { %v190_v45 = vpop.f32.mrb[2].mxu1 }
 0x1f0   :  { %v193_v46 = vmax.f32 %v188_v43, 0.0  ;;  %v253_v47 = vpop.f32.mrb[3].mxu1 }
 0x1f2   :  { %194 = vst [vmem:[#allocation8] sm:$0xff] %v193_v46 }
 0x1f3   :  { %339 = shalt.err (!%p336_p0)
}
 0x1f4   :  { %s340_s4 = scalar_lea.hbm %s459_s5, 128 }
 0x1f5   :  { %p341_p1 = scmp.ne.s32.totalorder %s459_s5, %s340_s4  ;;  %p344_p2 = scmp.lt.u32.totalorder %s340_s4, %s459_s5 }
 0x1f7   :  { %p346_p3 = pnand %p344_p2, %p341_p1 }
 0x1f9   :  { %349 = shalt.err (!%p346_p3)
}
 0x1fa   :  { %204 = dma.vmem_to_hbm [thread:$0]  %s202_s8, 128, %s459_s5, [#allocation4]  }
 0x1fb   :  { %354 = dma.done.wait [#allocation4], 128  }
 0x1fc   :  { %355 = vsyncadd [#allocation4], 4294967168 }
 0x1fd   :  { %208 = vsyncpa [#allocation3], 1 }
 0x1fe   :  { %209 = vsyncpa [#allocation6], 1 }
 0x1ff   :  { %210 = vsyncpa [#allocation4], 1 }

</bundles_post_ra>
